<compile_context>
chip_gen: v6e
topology: v6e:2x2x1
jax: 0.10.0
libtpu: 0.0.40
codegen_flags: <defaults>
</compile_context>

<pallas_src>
import functools

import jax
import jax.numpy as jnp
from jax.experimental import pallas as pl
from jax.experimental.pallas import tpu as pltpu


_LANES = 128
_SUBLANES = 8
# Per-input-block byte budget: ~1-2 MiB keeps DMA efficiency high (>= ~85% of
# HBM roofline class tiles) while 2x input + 2x output pipelined blocks stay
# well inside the scoped-VMEM defaults on v5e/v6e/v7x.
_DEFAULT_BLOCK_BUDGET = 2 * 1024 * 1024


def make_coefficients(rgb2gray="mean"):
    """Static Python-float coefficients (baked into the kernel as constants)."""
    if rgb2gray == "mean":
        return (1.0 / 3.0, 1.0 / 3.0, 1.0 / 3.0)
    elif rgb2gray in ("NTSC", "ntsc"):
        return (0.299, 0.587, 0.114)
    elif rgb2gray == "luminance":
        return (0.2126, 0.7152, 0.0722)
    elif rgb2gray == "r_channel":
        return (1.0, 0.0, 0.0)
    elif rgb2gray == "g_channel":
        return (0.0, 1.0, 0.0)
    elif rgb2gray == "b_channel":
        return (0.0, 0.0, 1.0)
    else:
        raise ValueError(f"unknown rgb2gray mode: {rgb2gray}")


def _pick_tile(total, quantum, max_tile):
    """Largest multiple of `quantum` dividing `total` and <= max_tile.

    Falls back to `total` (full-dim block, always a legal block shape).
    """
    best = None
    t = quantum
    limit = min(total, max_tile)
    while t <= limit:
        if total % t == 0:
            best = t
        t += quantum
    return best if best is not None else total


def _img_to_spec_kernel(x_ref, o_ref, *, coeffs, inverse, flip):
    # x_ref: VMEM (1, C, TR, L) block; o_ref: VMEM (1, 1, TR, L) block.
    # Weighted channel sum in float32 (coefficients are static constants).
    g = coeffs[0] * x_ref[0, 0].astype(jnp.float32)
    for c in range(1, len(coeffs)):
        g = g + coeffs[c] * x_ref[0, c].astype(jnp.float32)
    if inverse:
        g = 1.0 - g
    if flip:
        # In-tile sublane reverse; reversal of the tile *order* is handled by
        # the input index_map (output tile t reads input H-tile nH-1-t).
        g = jnp.flip(g, axis=0)
    o_ref[0, 0] = g.astype(o_ref.dtype)


def _call_flat(x, coeffs, *, inverse, block_budget_bytes):
    """Lane-dense path (flip == False and H*W % 128 == 0)."""
    B, C, H, W = x.shape
    R = (H * W) // _LANES
    x4 = x.reshape(B, C, R, _LANES)            # free reshape, contiguous NCHW
    itemsize = jnp.dtype(x.dtype).itemsize
    max_tr = max(1, block_budget_bytes // (C * _LANES * itemsize))
    TR = _pick_tile(R, _SUBLANES, max_tr)
    kernel = functools.partial(_img_to_spec_kernel, coeffs=coeffs,
                               inverse=inverse, flip=False)
    out = pl.pallas_call(
        kernel,
        out_shape=jax.ShapeDtypeStruct((B, 1, R, _LANES), x.dtype),
        grid=(B, R // TR),
        in_specs=[pl.BlockSpec((1, C, TR, _LANES), lambda b, t: (b, 0, t, 0))],
        out_specs=pl.BlockSpec((1, 1, TR, _LANES), lambda b, t: (b, 0, t, 0)),
        compiler_params=pltpu.CompilerParams(
            dimension_semantics=("parallel", "parallel")),
    )(x4)
    return out.reshape(B, 1, H, W)


def _call_rows(x, coeffs, *, inverse, flip, block_budget_bytes):
    """Row-structured path: (B, C, H, W) blocks tiled along H (needed for flip,
    or when H*W is not 128-aligned)."""
    B, C, H, W = x.shape
    itemsize = jnp.dtype(x.dtype).itemsize
    max_th = max(1, block_budget_bytes // (C * W * itemsize))
    TH = _pick_tile(H, _SUBLANES, max_th)
    nH = H // TH
    if flip:
        # Output tile t holds input H-tile (nH-1-t), reversed in-tile.
        in_map = lambda b, t: (b, 0, nH - 1 - t, 0)
    else:
        in_map = lambda b, t: (b, 0, t, 0)
    kernel = functools.partial(_img_to_spec_kernel, coeffs=coeffs,
                               inverse=inverse, flip=flip)
    return pl.pallas_call(
        kernel,
        out_shape=jax.ShapeDtypeStruct((B, 1, H, W), x.dtype),
        grid=(B, nH),
        in_specs=[pl.BlockSpec((1, C, TH, W), in_map)],
        out_specs=pl.BlockSpec((1, 1, TH, W), lambda b, t: (b, 0, t, 0)),
        compiler_params=pltpu.CompilerParams(
            dimension_semantics=("parallel", "parallel")),
    )(x)


def image_to_spec(x, coefficients, *, inverse=False, flip=False,
                  block_budget_bytes=_DEFAULT_BLOCK_BUDGET):
    """x: (B, C, H, W) float array, C in {1, 3}.  Returns (B, 1, H, W)."""
    B, C, H, W = x.shape
    coeffs = tuple(float(c) for c in coefficients)
    if len(coeffs) != 3:
        raise ValueError("expected 3 rgb2gray coefficients")
    if C == 1:
        # torch: x.repeat(1,3,1,1) then weighted sum == (c0+c1+c2) * x.
        # Fold the coefficients instead of materializing a 3x repeat.
        coeffs = (coeffs[0] + coeffs[1] + coeffs[2],)
    elif C != 3:
        raise ValueError(f"expected 1 or 3 channels, got {C}")

    if not flip:
        if (H * W) % _LANES == 0:
            return _call_flat(x, coeffs, inverse=inverse,
                              block_budget_bytes=block_budget_bytes)
        return _call_rows(x, coeffs, inverse=inverse, flip=False,
                          block_budget_bytes=block_budget_bytes)

    # flip == True: reversed H-tile indexing + in-tile sublane reverse.
    # If this Mosaic build cannot lower the in-kernel reverse (lax.rev), fall
    # back to the lane-dense no-flip kernel plus one wrapper-level flip pass
    # (correct; one extra HBM pass).  The fallback only triggers under eager
    # execution, which is how this script invokes the kernel.
    try:
        return _call_rows(x, coeffs, inverse=inverse, flip=True,
                          block_budget_bytes=block_budget_bytes)
    except Exception:
        # TODO(synk): drop this fallback once in-kernel sublane reverse is
        # guaranteed on all deployed Mosaic versions.
        out = image_to_spec(x, coefficients, inverse=inverse, flip=False,
                            block_budget_bytes=block_budget_bytes)
        return jnp.flip(out, axis=2)


def _reference(x, coefficients, inverse, flip):
    """Pure-JAX reference with the PyTorch module's semantics."""
    coef = jnp.asarray(coefficients, dtype=jnp.float32)
    xr = jnp.repeat(x, 3, axis=1) if x.shape[1] == 1 else x
    g = jnp.sum(xr.astype(jnp.float32) * coef.reshape(1, 3, 1, 1),
                axis=1, keepdims=True)
    if inverse:
        g = 1.0 - g
    if flip:
        g = jnp.flip(g, axis=2)
    return g.astype(x.dtype)


if __name__ == "__main__":
    key = jax.random.PRNGKey(0)
    k1, k2, k3, k4, k5 = jax.random.split(key, 5)

    x_rgb = jax.random.uniform(k1, (2, 3, 16, 16), dtype=jnp.float32)
    x_gray = jax.random.uniform(k2, (2, 1, 16, 16), dtype=jnp.float32)
    x_flip = jax.random.uniform(k3, (1, 3, 32, 128), dtype=jnp.float32)
    x_odd = jax.random.uniform(k4, (1, 3, 12, 20), dtype=jnp.float32)
    x_flat = jax.random.uniform(k5, (1, 3, 16, 128), dtype=jnp.float32)

    cases = [
        # (x, rgb2gray, inverse, flip, block_budget_bytes-or-None)
        (x_rgb, "NTSC", False, False, None),        # lane-dense flat path
        (x_rgb, "luminance", True, False, None),    # + inverse
        (x_gray, "mean", False, False, None),       # folded C==1 path
        (x_gray, "mean", True, True, None),         # C==1 + inverse + flip
        (x_flip, "mean", False, True, 16 * 1024),   # multi-tile flip (TH=8, nH=4)
        (x_odd, "r_channel", True, False, None),    # non-128-aligned fallback path
        (x_flat, "NTSC", False, False, 16 * 1024),  # multi-tile flat path (TR=8)
    ]

    for x, mode, inv, flp, budget in cases:
        coef = make_coefficients(mode)
        kwargs = dict(inverse=inv, flip=flp)
        if budget is not None:
            kwargs["block_budget_bytes"] = budget
        out = jax.block_until_ready(image_to_spec(x, coef, **kwargs))
        ref = _reference(x, coef, inv, flp)
        assert out.shape == ref.shape, (out.shape, ref.shape)
        assert jnp.allclose(out, ref, atol=1e-5, rtol=1e-5), (
            f"mismatch: mode={mode} inverse={inv} flip={flp}")

    print("KERNEL_OK")
</pallas_src>

<mosaic_0001>
module attributes {stable_mosaic.version = 11 : i64} {
  func.func @_img_to_spec_kernel(%arg0: i32, %arg1: i32, %arg2: memref<1x3x2x128xf32, #tpu.memory_space<vmem>>, %arg3: memref<1x1x2x128xf32, #tpu.memory_space<vmem>>) attributes {dimension_semantics = [#tpu.dimension_semantics<parallel>, #tpu.dimension_semantics<parallel>], iteration_bounds = array<i64: 2, 1>, scalar_prefetch = 0 : i64, scratch_operands = 0 : i64, tpu.core_type = #tpu.core_type<tc>, window_params = [{transform_indices = @transform_0, window_bounds = array<i64: 1, 3, 2, 128>}, {transform_indices = @transform_1, window_bounds = array<i64: 1, 1, 2, 128>}]} {
    %c0 = arith.constant 0 : index
    %c0_0 = arith.constant 0 : index
    %c0_1 = arith.constant 0 : index
    %c0_2 = arith.constant 0 : index
    %0 = vector.load %arg2[%c0, %c0_0, %c0_1, %c0_2] : memref<1x3x2x128xf32, #tpu.memory_space<vmem>>, vector<1x1x2x128xf32>
    %1 = vector.shape_cast %0 : vector<1x1x2x128xf32> to vector<2x128xf32>
    %cst = arith.constant 2.990000e-01 : f32
    %2 = vector.broadcast %cst : f32 to vector<2x128xf32>
    %3 = arith.mulf %2, %1 : vector<2x128xf32>
    %c0_3 = arith.constant 0 : index
    %c1 = arith.constant 1 : index
    %c0_4 = arith.constant 0 : index
    %c0_5 = arith.constant 0 : index
    %4 = vector.load %arg2[%c0_3, %c1, %c0_4, %c0_5] : memref<1x3x2x128xf32, #tpu.memory_space<vmem>>, vector<1x1x2x128xf32>
    %5 = vector.shape_cast %4 : vector<1x1x2x128xf32> to vector<2x128xf32>
    %cst_6 = arith.constant 5.870000e-01 : f32
    %6 = vector.broadcast %cst_6 : f32 to vector<2x128xf32>
    %7 = arith.mulf %6, %5 : vector<2x128xf32>
    %8 = arith.addf %3, %7 : vector<2x128xf32>
    %c0_7 = arith.constant 0 : index
    %c2 = arith.constant 2 : index
    %c0_8 = arith.constant 0 : index
    %c0_9 = arith.constant 0 : index
    %9 = vector.load %arg2[%c0_7, %c2, %c0_8, %c0_9] : memref<1x3x2x128xf32, #tpu.memory_space<vmem>>, vector<1x1x2x128xf32>
    %10 = vector.shape_cast %9 : vector<1x1x2x128xf32> to vector<2x128xf32>
    %cst_10 = arith.constant 1.140000e-01 : f32
    %11 = vector.broadcast %cst_10 : f32 to vector<2x128xf32>
    %12 = arith.mulf %11, %10 : vector<2x128xf32>
    %13 = arith.addf %8, %12 : vector<2x128xf32>
    %c0_11 = arith.constant 0 : index
    %c0_12 = arith.constant 0 : index
    %c0_13 = arith.constant 0 : index
    %c0_14 = arith.constant 0 : index
    %14 = vector.load %arg3[%c0_11, %c0_12, %c0_13, %c0_14] : memref<1x1x2x128xf32, #tpu.memory_space<vmem>>, vector<1x1x2x128xf32>
    %15 = vector.shape_cast %14 : vector<1x1x2x128xf32> to vector<2x128xf32>
    %16 = vector.shape_cast %13 : vector<2x128xf32> to vector<1x1x2x128xf32>
    tpu.vector_store %arg3[%c0_11, %c0_12, %c0_13, %c0_14], %16 {strides = array<i32>} : memref<1x1x2x128xf32, #tpu.memory_space<vmem>>, vector<1x1x2x128xf32>,
    return
  }
  func.func @transform_0(%arg0: i32, %arg1: i32) -> (i32, i32, i32, i32) {
    %c0_i32 = arith.constant 0 : i32
    %c0_i32_0 = arith.constant 0 : i32
    %c0_i32_1 = arith.constant 0 : i32
    return %arg0, %c0_i32, %arg1, %c0_i32_0 : i32, i32, i32, i32
  }
  func.func @transform_1(%arg0: i32, %arg1: i32) -> (i32, i32, i32, i32) {
    %c0_i32 = arith.constant 0 : i32
    %c0_i32_0 = arith.constant 0 : i32
    %c0_i32_1 = arith.constant 0 : i32
    return %arg0, %c0_i32, %arg1, %c0_i32_0 : i32, i32, i32, i32
  }
}

</mosaic_0001>

<bundles_post_ra>
// kernel: tpu_custom_call.1
= control target key start
LH: loop header
LB: loop body
LE: loop exit
PB: predicated region body
PF: predicated region fallthrough
CT: control target
= control target key end

     0   :  { %6 = vsyncpa [#allocation3], 0  ;;  %s596_s0 = inlined_call_operand.hbm [shape: f32[2,3,2,128], index: 0, kind: input, shape index: {}]   ;;  %s597_s1 = inlined_call_operand.hbm [shape: f32[2,1,2,128], index: 1, kind: output, shape index: {}]  }
   0x1   :  { %8 = vsyncpa [#allocation3 + $0x1], 0 }
   0x2   :  { %9 = vsyncpa [#allocation4], 0 }
   0x3   :  { %11 = vsyncpa [#allocation4 + $0x1], 0  ;;  %s463_s6 = smov 0   ;;  %s465_s7 = smov 0  }
   0x4   :  { %s467_s8 = smov 0   ;;  %s469_s9 = smov 0  }
   0x5   :  { %s471_s10 = smov 0   ;;  %s473_s11 = smov 0  }
   0x6 LB: > { %s259_s12 = sadd.s32 4294967295, %s447_s11   ;;  %s260_s13 = sadd.s32 4294967294, %s447_s11   ;;  %s447_s11 = sphi %s473_s11, %s17_s11   ;;  %s443_s10 = sphi %s471_s10, %s608_s10   ;;  %s439_s9 = sphi %s469_s9, %s607_s9   ;;  %s435_s8 = sphi %s467_s8, %s606_s8   ;;  %s431_s7 = sphi %s465_s7, %s605_s7   ;;  %s427_s6 = sphi %s463_s6, %s604_s6  }
   0x7   : > { %s29_s14 = sadd.s32 1, %s443_s10  ;;  %s38_s15 = sadd.s32 1, %s435_s8 }
   0x8   : > { %p31_p0 = scmp.ge.s32.totalorder %s29_s14, 2  ;;  %p45_p1 = scmp.ne.s32.totalorder %s435_s8, %s431_s7 }
   0x9   : > { %p46_p2 = scmp.eq.s32.totalorder %s447_s11, 0  ;;  %p51_p3 = scmp.ne.s32.totalorder %s431_s7, %s427_s6 }
   0xa   : > { %s610_s14 = smov (%p31_p0, %s29_s14), 0  ;;  %p52_p5 = scmp.eq.s32.totalorder %s259_s12, 0 }
   0xb   : > { %p504_p4 = por %p46_p2, %p45_p1  ;;  %s33_s17 = ssub.s32 %s443_s10, %s610_s14 }
   0xc   : > { %p77_p6 = scmp.eq.s32.totalorder %s259_s12, 1  ;;  %p36_p7 = scmp.eq.s32.totalorder %s33_s17, 0 }
   0xd   : > { %p510_p8 = por %p52_p5, %p51_p3  ;;  %p83_p10 = scmp.eq.s32.totalorder %s260_s13, 1 }
   0xe   : > { %p514_p9 = por %p77_p6, %p45_p1  ;;  %p287_p13 = scmp.lt.s32.totalorder %s447_s11, 2 }
   0xf   : > { %s519_s20 = scalar_select %p36_p7, %s435_s8, %s38_s15  }
  0x10   : > { %p521_p11 = por %p83_p10, %p51_p3  ;;  %s103_s22 = sand.u32 1, %s435_s8  }
  0x11   : > { %s272_s23 = smul.u32 6, %s103_s22  ;;  %p531_p0 = pnand %p287_p13, %p504_p4 }
  0x12   : > { %s273_s24 = smul.u32 96, %s443_s10  ;;  %p264_p1 = scmp.ge.s32.totalorder %s447_s11, 1 }
  0x13   : > { %s107_s29 = scalar_lea.vmem [#allocation2], %s272_s23  ;;  %s104_s2 = scalar_lea.sflag [#allocation3], %s103_s22 }
  0x14   : > { %s114_s28 = scalar_lea.hbm %s596_s0, %s273_s24  ;;  %s115_s30 = sshll.u32 %s107_s29, 4  ;;  %s116_s30 = int_to_ptr.vmem [resolvable:$true] %s115_s30 }
  0x15   : > { %p341_p2 = pneg %p531_p0  ;;  %s352_s3 = scalar_lea.vmem %s116_s30, 96 }
  0x16   : > { %p353_p3 = scmp.ne.s32.totalorder %s116_s30, %s352_s3  ;;  %s449_s4 = smov [#allocation2]  }
  0x17   : > { %s357_s5 = sshll.u32 %s449_s4, 4  ;;  %s358_s5 = int_to_ptr.vmem [resolvable:$false] %s357_s5 }
  0x18   : > { %p355_p5 = pnand %p353_p3, %p341_p2  ;;  %s359_s12 = scalar_lea.vmem %s358_s5, 192 }
  0x19   : > { %p360_p4 = scmp.lt.s32.totalorder %s116_s30, %s358_s5  ;;  %p361_p7 = scmp.lt.s32.totalorder %s359_s12, %s352_s3 }
  0x1a   : > { %p356_p6 = pneg %p355_p5 }
  0x1b   : > { %p362_p10 = por %p361_p7, %p360_p4 }
  0x1d   : > { %p363_p13 = pnand %p362_p10, %p356_p6 }
  0x1f   : > { %366 = shalt.err (!%p363_p13)
}
  0x20   : > { %s450_s13 = smov 32   ;;  %s451_s15 = smov 2  }
  0x21   : > { %282 = dma.hbm_to_vmem [thread:$0]  (!%p531_p0), %s114_s28, 96, %s116_s30, %s104_s2, %s450_s13, %s450_s13, %s451_s15  }
  0x22   : > { %p123_p12 = scmp.lt.s32.totalorder %s447_s11, 3 }
  0x24   : > { %p124_p2 = pnand %p264_p1, %p123_p12 }
  0x25   : > { %s547_s16 = sand.u32 (!%p124_p2), 1, %s431_s7  }
  0x26   : > { %127 = sbr.rel (%p124_p2) target bundleno = 70 (0x46), region = 24  ;;  %s130_s22 = scalar_lea.sflag (!%p124_p2), [#allocation3], %s547_s16 }
  0x27   : > { %s274_s17 = smul.u32 (!%p124_p2), 6, %s547_s16 }
  0x29   : > { %s133_s23 = scalar_lea.vmem (!%p124_p2), [#allocation2], %s274_s17 }
  0x2b   : > { %418 = dma.done.wait (%p510_p8), %s130_s22, 96  }
  0x2c   : > { %420 = vsyncadd (%p510_p8), %s130_s22, 4294967200  ;;  %s265_s24 = sshll.u32 %s547_s16, 1  ;;  %v152_v0 = vld [vmem:[%s133_s23] sm:$0x3]  ;;  %v266_v1 = vld [vmem:[%s133_s23 + $0x2] sm:$0x3] }
  0x2d   : > { %v267_v2 = vld [vmem:[%s133_s23 + $0x4] sm:$0x3]  ;;  %v153_v3 = vmul.f32 0.299, %v152_v0  ;;  %v156_v4 = vmul.f32 0.587, %v266_v1 }
  0x2e   : > { %v160_v5 = vmul.f32 0.114, %v267_v2  ;;  %s151_s25 = scalar_lea.vmem [#allocation5], %s265_s24  ;;  %s269_s27 = sshll.u32 %s439_s9, 5 }
  0x2f   : > { %s178_s26 = sshll.u32 %s151_s25, 4  ;;  %v157_v6 = vadd.f32 %v156_v4, %v153_v3  ;;  %s176_s29 = scalar_lea.hbm %s597_s1, %s269_s27  ;;  %s179_s26 = int_to_ptr.vmem [resolvable:$true] %s178_s26 }
  0x30   : > { %s164_s30 = scalar_lea.sflag [#allocation4], %s547_s16  ;;  %s367_s2 = scalar_lea.vmem %s179_s26, 32 }
  0x31   : > { %v161_v7 = vadd.f32 %v160_v5, %v157_v6  ;;  %p368_p8 = scmp.ne.s32.totalorder %s179_s26, %s367_s2  ;;  %s452_s3 = smov [#allocation5]  }
  0x32   : > { %s371_s4 = sshll.u32 %s452_s3, 4  ;;  %s372_s4 = int_to_ptr.vmem [resolvable:$false] %s371_s4 }
  0x33   : > { %162 = vst [vmem:[%s151_s25] sm:$0x3] %v161_v7  ;;  %p369_p12 = pnand %p368_p8, %p514_p9  ;;  %s373_s5 = scalar_lea.vmem %s372_s4, 64 }
  0x34   : > { %p374_p1 = scmp.lt.s32.totalorder %s179_s26, %s372_s4  ;;  %p375_p3 = scmp.lt.s32.totalorder %s373_s5, %s367_s2 }
  0x35   : > { %p370_p0 = pneg %p369_p12 }
  0x36   : > { %p376_p5 = por %p375_p3, %p374_p1 }
  0x38   : > { %p377_p6 = pnand %p376_p5, %p370_p0 }
  0x3a   : > { %380 = shalt.err (!%p377_p6)
}
  0x3b   : > { %s381_s9 = scalar_lea.hbm %s176_s29, 32  ;;  %s385_s15 = scalar_lea.hbm %s597_s1, 64 }
  0x3c   : > { %p382_p4 = scmp.ne.s32.totalorder %s176_s29, %s381_s9  ;;  %p386_p13 = scmp.lt.s32.totalorder %s176_s29, %s597_s1 }
  0x3d   : > { %p387_p2 = scmp.lt.s32.totalorder %s385_s15, %s381_s9 }
  0x3e   : > { %p383_p7 = pnand %p382_p4, %p514_p9 }
  0x3f   : > { %p388_p8 = por %p387_p2, %p386_p13 }
  0x40   : > { %p384_p10 = pneg %p383_p7 }
  0x42   : > { %p389_p12 = pnand %p388_p8, %p384_p10 }
  0x44   : > { %392 = shalt.err (!%p389_p12)
}
  0x45   : > { %277 = dma.vmem_to_hbm [thread:$0]  (%p514_p9), %s179_s26, 32, %s176_s29, %s164_s30  }
  0x46 PF: > { %s190_s22 = sand.u32 1, %s427_s6   ;;  %p603_p0 = scmp.ge.s32.totalorder %s447_s11, 2 }
  0x47   : > { %s191_s23 = scalar_lea.sflag [#allocation4], %s190_s22 }
  0x48   : > { %p284_p1 = pnand %p603_p0, %p521_p11 }
  0x4a   : > { %p285_p3 = pneg %p284_p1 }
  0x4c   : > { %422 = dma.done.wait (%p285_p3), %s191_s23, 32  }
  0x4d   : > { %424 = vsyncadd (%p285_p3), %s191_s23, 4294967264  ;;  %s17_s11 = sadd.s32 1, %s447_s11   ;;  %s604_s6 = smov %s431_s7 }
  0x4e   : > { %p14_p5 = scmp.ge.s32.totalorder %s17_s11, 4   ;;  %s605_s7 = smov %s435_s8 }
  0x4f   : > { %s606_s8 = smov %s519_s20  ;;  %s607_s9 = smov %s443_s10 }
  0x50   : > { %s608_s10 = smov %s610_s14  ;;  %16 = sbr.rel (!%p14_p5) target bundleno = 6 (0x6), region = 71 }
  0x55   :  { %196 = vsyncpa [#allocation3], 1 }
  0x56   :  { %198 = vsyncpa [#allocation3 + $0x1], 1 }
  0x57   :  { %199 = vsyncpa [#allocation4], 1 }
  0x58   :  { %201 = vsyncpa [#allocation4 + $0x1], 1 }

</bundles_post_ra>
